<compile_context>
chip_gen: v5e
topology: v5e:2x2
jax: 0.10.0
libtpu: 0.0.40
codegen_flags: <defaults>
</compile_context>

<pallas_src>
import functools

import jax
import jax.numpy as jnp
from jax import lax
from jax.experimental import pallas as pl
from jax.experimental.pallas import tpu as pltpu

EPS = 1e-5


def _round_up(x, m):
    return ((x + m - 1) // m) * m


def layernorm_kernel(x_ref, scale_ref, shift_ref, o_ref, *, d_valid):
    # x_ref: (TR, Dp) tile; scale/shift: (1, Dp) resident params.
    x = x_ref[...].astype(jnp.float32)
    d_padded = x.shape[-1]

    if d_valid != d_padded:
        lane = lax.broadcasted_iota(jnp.int32, x.shape, dimension=1)
        mask = (lane < d_valid).astype(jnp.float32)
        x = x * mask  # zero out pad lanes (defensive; wrapper pads with zeros)
    else:
        mask = None

    inv_d = jnp.float32(1.0 / d_valid)  # static scalar, no divide on the VPU

    # Mean over valid lanes (pad lanes are zero, so plain sum is correct).
    mean = jnp.sum(x, axis=-1, keepdims=True) * inv_d

    centered = x - mean
    if mask is not None:
        centered = centered * mask  # pad lanes would otherwise contribute mean^2

    # Population (unbiased=False) variance, eps inside rsqrt -> matches PyTorch.
    var = jnp.sum(centered * centered, axis=-1, keepdims=True) * inv_d
    inv_std = lax.rsqrt(var + EPS)

    out = scale_ref[...] * (centered * inv_std) + shift_ref[...]
    o_ref[...] = out.astype(o_ref.dtype)


def _choose_row_tile(r, d_padded, bytes_per_el=4):
    # Keep ~4 buffered (TR, Dp) f32 tiles under a conservative ~16 MiB budget
    # (safe under the scoped-VMEM defaults on v5e/v6e/v7x).
    budget = 16 * 1024 * 1024
    max_rows = max(8, budget // (4 * d_padded * bytes_per_el))
    tr = min(512, max_rows, _round_up(r, 8))
    tr = max(8, (tr // 8) * 8)
    return tr


def layer_normalization(x, scale, shift):
    """x: (R, D); scale/shift: (D,). Returns LayerNorm(x) with eps=1e-5."""
    R, D = x.shape

    # Lane-dense padding of the feature axis to a multiple of 128.
    Dp = _round_up(D, 128)
    TR = _choose_row_tile(R, Dp)
    Rp = _round_up(R, TR)

    x_p = jnp.pad(x, ((0, Rp - R), (0, Dp - D)))
    scale_p = jnp.pad(scale.reshape(1, D), ((0, 0), (0, Dp - D)))
    shift_p = jnp.pad(shift.reshape(1, D), ((0, 0), (0, Dp - D)))

    kernel = functools.partial(layernorm_kernel, d_valid=D)

    out_p = pl.pallas_call(
        kernel,
        out_shape=jax.ShapeDtypeStruct((Rp, Dp), x.dtype),
        grid=(Rp // TR,),
        in_specs=[
            pl.BlockSpec((TR, Dp), lambda i: (i, 0)),   # x tile, pipelined
            pl.BlockSpec((1, Dp), lambda i: (0, 0)),    # scale: resident
            pl.BlockSpec((1, Dp), lambda i: (0, 0)),    # shift: resident
        ],
        out_specs=pl.BlockSpec((TR, Dp), lambda i: (i, 0)),
        compiler_params=pltpu.CompilerParams(
            dimension_semantics=("parallel",),
        ),
    )(x_p, scale_p, shift_p)

    return out_p[:R, :D]


def layer_normalization_ref(x, scale, shift):
    mean = jnp.mean(x, axis=-1, keepdims=True)
    var = jnp.mean((x - mean) ** 2, axis=-1, keepdims=True)
    return scale * (x - mean) / jnp.sqrt(var + EPS) + shift


if __name__ == "__main__":
    # Small shape consistent with the PyTorch example: batch=2, D=5.
    embedding_dimension = 5
    batch = 2

    scale = jnp.ones((embedding_dimension,), dtype=jnp.float32)   # torch.ones
    shift = jnp.zeros((embedding_dimension,), dtype=jnp.float32)  # torch.zeros

    key = jax.random.PRNGKey(0)
    x = jax.random.normal(key, (batch, embedding_dimension), dtype=jnp.float32)

    out = layer_normalization(x, scale, shift)
    out = jax.block_until_ready(out)

    ref = layer_normalization_ref(x, scale, shift)
    assert jnp.allclose(out, ref, atol=1e-5, rtol=1e-5), "mismatch vs reference"

    # Normalized output: ~0 mean, ~unit (biased) variance per row.
    row_mean = jnp.mean(out, axis=-1)
    row_var = jnp.mean((out - jnp.mean(out, axis=-1, keepdims=True)) ** 2, axis=-1)
    assert jnp.allclose(row_mean, 0.0, atol=1e-5)
    assert jnp.allclose(row_var, 1.0, atol=1e-3)

    # Second test: larger, non-(8,128)-aligned shape to exercise tiling + lane
    # masking (R=300, D=1000 -> padded to (TR-multiple, 1024)).
    key2 = jax.random.PRNGKey(0)
    R2, D2 = 300, 1000
    x2 = jax.random.normal(key2, (R2, D2), dtype=jnp.float32) * 3.0 + 1.5
    s2 = jax.random.normal(jax.random.PRNGKey(1), (D2,), dtype=jnp.float32)
    b2 = jax.random.normal(jax.random.PRNGKey(2), (D2,), dtype=jnp.float32)
    out2 = jax.block_until_ready(layer_normalization(x2, s2, b2))
    ref2 = layer_normalization_ref(x2, s2, b2)
    assert jnp.allclose(out2, ref2, atol=1e-4, rtol=1e-4), "mismatch on tiled case"

    print("KERNEL_OK")
</pallas_src>

<mosaic_0001>
module attributes {stable_mosaic.version = 11 : i64} {
  func.func @layernorm_kernel(%arg0: i32, %arg1: memref<8x128xf32, #tpu.memory_space<vmem>>, %arg2: memref<1x128xf32, #tpu.memory_space<vmem>>, %arg3: memref<1x128xf32, #tpu.memory_space<vmem>>, %arg4: memref<8x128xf32, #tpu.memory_space<vmem>>) attributes {dimension_semantics = [#tpu.dimension_semantics<parallel>], iteration_bounds = array<i64: 1>, scalar_prefetch = 0 : i64, scratch_operands = 0 : i64, tpu.core_type = #tpu.core_type<tc>, window_params = [{transform_indices = @transform_0, window_bounds = array<i64: 8, 128>}, {pipeline_mode = #tpu.pipeline_mode<synchronous>, transform_indices = @transform_1, window_bounds = array<i64: 1, 128>}, {pipeline_mode = #tpu.pipeline_mode<synchronous>, transform_indices = @transform_2, window_bounds = array<i64: 1, 128>}, {transform_indices = @transform_3, window_bounds = array<i64: 8, 128>}]} {
    %c0 = arith.constant 0 : index
    %c0_0 = arith.constant 0 : index
    %0 = vector.load %arg1[%c0, %c0_0] : memref<8x128xf32, #tpu.memory_space<vmem>>, vector<8x128xf32>
    %1 = tpu.iota {dimensions = array<i32: 1>} : vector<8x128xi32>
    %c5_i32 = arith.constant 5 : i32
    %2 = vector.broadcast %c5_i32 : i32 to vector<8x128xi32>
    %3 = arith.cmpi slt, %1, %2 : vector<8x128xi32>
    %4 = arith.extui %3 : vector<8x128xi1> to vector<8x128xi32>
    %5 = arith.sitofp %4 : vector<8x128xi32> to vector<8x128xf32>
    %6 = arith.mulf %0, %5 : vector<8x128xf32>
    %cst = arith.constant dense<0.000000e+00> : vector<8xf32>
    %7 = vector.multi_reduction <add>, %6, %cst [1] : vector<8x128xf32> to vector<8xf32>
    %8 = vector.shape_cast %7 : vector<8xf32> to vector<8x1xf32>
    %cst_1 = arith.constant 2.000000e-01 : f32
    %9 = vector.broadcast %cst_1 : f32 to vector<8x1xf32>
    %10 = arith.mulf %8, %9 : vector<8x1xf32>
    %11 = vector.broadcast %10 : vector<8x1xf32> to vector<8x128xf32>
    %12 = arith.subf %6, %11 : vector<8x128xf32>
    %13 = arith.mulf %12, %5 : vector<8x128xf32>
    %14 = arith.mulf %13, %13 : vector<8x128xf32>
    %cst_2 = arith.constant dense<0.000000e+00> : vector<8xf32>
    %15 = vector.multi_reduction <add>, %14, %cst_2 [1] : vector<8x128xf32> to vector<8xf32>
    %16 = vector.shape_cast %15 : vector<8xf32> to vector<8x1xf32>
    %cst_3 = arith.constant 2.000000e-01 : f32
    %17 = vector.broadcast %cst_3 : f32 to vector<8x1xf32>
    %18 = arith.mulf %16, %17 : vector<8x1xf32>
    %cst_4 = arith.constant 9.99999974E-6 : f32
    %19 = vector.broadcast %cst_4 : f32 to vector<8x1xf32>
    %20 = arith.addf %18, %19 : vector<8x1xf32>
    %21 = math.rsqrt %20 : vector<8x1xf32>
    %c0_5 = arith.constant 0 : index
    %c0_6 = arith.constant 0 : index
    %22 = vector.load %arg2[%c0_5, %c0_6] : memref<1x128xf32, #tpu.memory_space<vmem>>, vector<1x128xf32>
    %23 = vector.broadcast %21 : vector<8x1xf32> to vector<8x128xf32>
    %24 = arith.mulf %13, %23 : vector<8x128xf32>
    %25 = vector.broadcast %22 : vector<1x128xf32> to vector<8x128xf32>
    %26 = arith.mulf %25, %24 : vector<8x128xf32>
    %c0_7 = arith.constant 0 : index
    %c0_8 = arith.constant 0 : index
    %27 = vector.load %arg3[%c0_7, %c0_8] : memref<1x128xf32, #tpu.memory_space<vmem>>, vector<1x128xf32>
    %28 = vector.broadcast %27 : vector<1x128xf32> to vector<8x128xf32>
    %29 = arith.addf %26, %28 : vector<8x128xf32>
    %c0_9 = arith.constant 0 : index
    %c0_10 = arith.constant 0 : index
    %30 = vector.load %arg4[%c0_9, %c0_10] : memref<8x128xf32, #tpu.memory_space<vmem>>, vector<8x128xf32>
    tpu.vector_store %arg4[%c0_9, %c0_10], %29 {strides = array<i32>} : memref<8x128xf32, #tpu.memory_space<vmem>>, vector<8x128xf32>,
    return
  }
  func.func @transform_0(%arg0: i32) -> (i32, i32) {
    %c0_i32 = arith.constant 0 : i32
    %c0_i32_0 = arith.constant 0 : i32
    return %arg0, %c0_i32 : i32, i32
  }
  func.func @transform_1(%arg0: i32) -> (i32, i32) {
    %c0_i32 = arith.constant 0 : i32
    %c0_i32_0 = arith.constant 0 : i32
    %c0_i32_1 = arith.constant 0 : i32
    return %c0_i32, %c0_i32_0 : i32, i32
  }
  func.func @transform_2(%arg0: i32) -> (i32, i32) {
    %c0_i32 = arith.constant 0 : i32
    %c0_i32_0 = arith.constant 0 : i32
    %c0_i32_1 = arith.constant 0 : i32
    return %c0_i32, %c0_i32_0 : i32, i32
  }
  func.func @transform_3(%arg0: i32) -> (i32, i32) {
    %c0_i32 = arith.constant 0 : i32
    %c0_i32_0 = arith.constant 0 : i32
    return %arg0, %c0_i32 : i32, i32
  }
}

</mosaic_0001>

<bundles_post_ra>
// kernel: tpu_custom_call.1
= control target key start
LH: loop header
LB: loop body
LE: loop exit
PB: predicated region body
PF: predicated region fallthrough
CT: control target
= control target key end

     0   :  { %8 = vsyncpa [#allocation3], 0  ;;  %s223_s0 = inlined_call_operand.hbm [shape: f32[8,128], index: 0, kind: input, shape index: {}]   ;;  %s224_s1 = inlined_call_operand.hbm [shape: f32[1,128], index: 1, kind: input, shape index: {}]   ;;  %s225_s2 = inlined_call_operand.vmem [shape: f32[1,128], index: 2, kind: input, shape index: {}]   ;;  %s226_s3 = inlined_call_operand.hbm [shape: f32[8,128], index: 3, kind: output, shape index: {}]  }
   0x1   :  { %9 = vsyncpa [#allocation6], 0 }
   0x2   :  { %10 = vsyncpa [#allocation4], 0  ;;  %s16_s14 = sshll.u32 %s223_s0, 4  ;;  %s187_s15 = smov [#allocation2]   ;;  %s17_s14 = int_to_ptr.hbm [resolvable:$true] %s16_s14 }
   0x3   :  { %s18_s16 = sshll.u32 %s187_s15, 4  ;;  %s27_s19 = sshll.u32 %s224_s1, 4  ;;  %s19_s16 = int_to_ptr.vmem [resolvable:$true] %s18_s16  ;;  %s28_s19 = int_to_ptr.hbm [resolvable:$true] %s27_s19 }
   0x4   :  { %21 = dma.hbm_to_vmem [thread:$0]  %s17_s14, 128, %s19_s16, [#allocation3]  }
   0x5   :  { %s188_s20 = smov [#allocation5]  }
   0x6   :  { %s29_s21 = sshll.u32 %s188_s20, 4  ;;  %s30_s21 = int_to_ptr.vmem [resolvable:$true] %s29_s21 }
   0x7   :  { %32 = dma.hbm_to_vmem [thread:$0]  %s28_s19, 16, %s30_s21, [#allocation6]  }
   0x8   :  { %181 = dma.done.wait [#allocation3], 128  }
   0x9   :  { %182 = vsyncadd [#allocation3], 4294967168 }
   0xa   :  { %183 = dma.done.wait [#allocation6], 16  }
   0xb   :  { %184 = vsyncadd [#allocation6], 4294967280  ;;  %v44_v0 = vlaneseq  ;;  %v189_v2 = vmov 0.0   ;;  %v43_v4 = vld [vmem:[#allocation2] sm:$0xff]  ;;  %v105_v20 = vld [vmem:[#allocation5] ss:$0 sm:$0xff] }
   0xc   :  { %v106_v23 = vld [vmem:[%s225_s2] ss:$0 sm:$0xff]  ;;  %s190_s22 = smov [#allocation7]   ;;  %s89_s26 = sshll.u32 %s226_s3, 4  ;;  %s90_s26 = int_to_ptr.hbm [resolvable:$true] %s89_s26 }
   0xd   :  { %v45_v1 = vand.u32 127, %v44_v0  ;;  %s87_s23 = sshll.u32 %s190_s22, 4  ;;  %s88_s23 = int_to_ptr.vmem [resolvable:$true] %s87_s23 }
   0xf   :  { %vm46_vm0 = vcmp.lt.s32.totalorder %v45_v1, 5 }
  0x10   :  { %v100_v3 = vsel %vm46_vm0, 1.0, %v189_v2 }
  0x11   :  { %v49_v5 = vmul.f32 %v100_v3, %v43_v4 }
  0x13   :  { %50 = vadd.xlane.f32.xlu0 %v49_v5 }
  0x86   :  { %v51_v6 = vpop.xlane.xlu0 %50 }
  0x87   :  { %v52_v7 = vmul.f32 0.2, %v51_v6 }
  0x89   :  { %v53_v8 = vsub.f32 %v49_v5, %v52_v7 }
  0x8b   :  { %v54_v9 = vmul.f32 %v100_v3, %v53_v8 }
  0x8d   :  { %v55_v10 = vmul.f32 %v54_v9, %v54_v9 }
  0x8f   :  { %56 = vadd.xlane.f32.xlu0 %v55_v10 }
 0x102   :  { %v57_v11 = vpop.xlane.xlu0 %56 }
 0x103   :  { %v58_v12 = vmul.f32 0.2, %v57_v11 }
 0x105   :  { %v59_v13 = vadd.f32 1e-05, %v58_v12 }
 0x107   :  { %107 = vrsqrt.f32 %v59_v13  ;;  %vm66_vm2 = vweird.f32 %v59_v13 }
 0x10d   :  { %v108_v14 = vpop.eup %107 }
 0x10e   :  { %v61_v15 = vmul.f32 %v108_v14, %v59_v13  ;;  %vm67_vm1 = vweird.f32 %v108_v14 }
 0x10f   :  { %vm68_vm3 = vmor %vm66_vm2, %vm67_vm1 }
 0x110   :  { %v62_v16 = vmul.f32 %v108_v14, %v61_v15 }
 0x112   :  { %v63_v17 = vmul.f32 0.5, %v62_v16 }
 0x114   :  { %v64_v18 = vsub.f32 1.5, %v63_v17 }
 0x116   :  { %v65_v19 = vmul.f32 %v108_v14, %v64_v18 }
 0x118   :  { %v69_v21 = vsel %vm68_vm3, %v108_v14, %v65_v19 }
 0x119   :  { %v71_v22 = vmul.f32 %v69_v21, %v54_v9 }
 0x11b   :  { %v75_v24 = vmul.f32 %v105_v20, %v71_v22 }
 0x11d   :  { %v80_v25 = vadd.f32 %v106_v23, %v75_v24 }
 0x11f   :  { %81 = vst [vmem:[#allocation7] sm:$0xff] %v80_v25 }
 0x120   :  { %92 = dma.vmem_to_hbm [thread:$0]  %s88_s23, 128, %s90_s26, [#allocation4]  }
 0x121   :  { %185 = dma.done.wait [#allocation4], 128  }
 0x122   :  { %186 = vsyncadd [#allocation4], 4294967168 }
 0x123   :  { %97 = vsyncpa [#allocation3], 1 }
 0x124   :  { %98 = vsyncpa [#allocation6], 1 }
 0x125   :  { %99 = vsyncpa [#allocation4], 1 }

</bundles_post_ra>
